<compile_context>
chip_gen: v7x
topology: tpu7x:2x2x1
jax: 0.10.0
libtpu: 0.0.40
codegen_flags: <defaults>
</compile_context>

<pallas_src>
import functools

import jax
import jax.numpy as jnp
from jax.experimental import pallas as pl
from jax.experimental.pallas import tpu as pltpu

LANE = 128          # vreg lane width
SUBLANE_BF16 = 16   # bf16 native sublane packing (16, 128)


def mlp_kernel(x_ref,
               w1_ref, b1_ref,
               w2_ref, b2_ref,
               w3_ref, b3_ref,
               w4_ref, b4_ref,
               o_ref):
    # x_ref: (TB, in_f) f32 batch tile (feature dim unpadded).
    # w*_ref: bf16, lane-padded to 128.  b*_ref: f32 (1, 128).
    # Matmuls run bf16 on the MXU with f32 accumulation; bias+ReLU in f32.
    x = x_ref[...].astype(jnp.bfloat16)

    h = jnp.dot(x, w1_ref[...], preferred_element_type=jnp.float32) + b1_ref[...]
    h = jnp.maximum(h, 0.0).astype(jnp.bfloat16)

    h = jnp.dot(h, w2_ref[...], preferred_element_type=jnp.float32) + b2_ref[...]
    h = jnp.maximum(h, 0.0).astype(jnp.bfloat16)

    h = jnp.dot(h, w3_ref[...], preferred_element_type=jnp.float32) + b3_ref[...]
    h = jnp.maximum(h, 0.0).astype(jnp.bfloat16)

    out = jnp.dot(h, w4_ref[...], preferred_element_type=jnp.float32) + b4_ref[...]
    o_ref[...] = out.astype(o_ref.dtype)   # bf16, lane-dense store


def _round_up(n, m):
    return pl.cdiv(n, m) * m


def _pad2d(a, rows, cols, dtype):
    r, c = a.shape
    return jnp.pad(a, ((0, rows - r), (0, cols - c))).astype(dtype)


def prepare_params(params):
    """Pad/cast weights & biases ONCE (outside the per-call forward).
    Weights -> bf16 with output dims lane-padded to 128 (w1 keeps its unpadded
    input dim). Biases stay f32 (bias add happens in f32)."""
    in_f, hidden = params["w1"].shape
    classes = params["w4"].shape[1]
    hid_p = _round_up(hidden, LANE)
    cls_p = _round_up(classes, LANE)
    return dict(
        w1=_pad2d(params["w1"], in_f, hid_p, jnp.bfloat16),
        w2=_pad2d(params["w2"], hid_p, hid_p, jnp.bfloat16),
        w3=_pad2d(params["w3"], hid_p, hid_p, jnp.bfloat16),
        w4=_pad2d(params["w4"], hid_p, cls_p, jnp.bfloat16),
        b1=_pad2d(params["b1"], 1, hid_p, jnp.float32),
        b2=_pad2d(params["b2"], 1, hid_p, jnp.float32),
        b3=_pad2d(params["b3"], 1, hid_p, jnp.float32),
        b4=_pad2d(params["b4"], 1, cls_p, jnp.float32),
    )


@functools.partial(jax.jit, static_argnames=("classes", "tb"))
def neural_net_forward(x, pparams, classes, tb=1024):
    """x: (B, InputSize) f32. pparams: output of prepare_params().
    Returns (B, classes) f32 logits."""
    B, in_f = x.shape
    hid_p = pparams["w1"].shape[1]
    cls_p = pparams["w4"].shape[1]

    # Batch tile: <= tb, 16-row aligned (bf16 packing), and split into >= 2
    # grid steps whenever the batch allows so both v7x TensorCores get work.
    tb = max(SUBLANE_BF16, (tb // SUBLANE_BF16) * SUBLANE_BF16)
    tb_eff = max(SUBLANE_BF16, min(tb, _round_up(B, SUBLANE_BF16)))
    if (_round_up(B, SUBLANE_BF16) >= 2 * SUBLANE_BF16
            and _round_up(B, tb_eff) // tb_eff < 2):
        tb_eff = _round_up(pl.cdiv(_round_up(B, SUBLANE_BF16), 2), SUBLANE_BF16)
    Bp = _round_up(B, tb_eff)
    grid = (Bp // tb_eff,)

    # Only batch rows get padded (and only if needed). Feature dim stays at
    # in_f and x stays f32 in HBM; the kernel casts it to bf16.
    xp = x if Bp == B else jnp.pad(x, ((0, Bp - B), (0, 0)))

    flops = 2 * Bp * (in_f * hid_p + 2 * hid_p * hid_p + hid_p * cls_p)
    bytes_accessed = (
        Bp * in_f * 4                                                 # x (f32)
        + (in_f * hid_p + 2 * hid_p * hid_p + hid_p * cls_p) * 2     # weights (bf16)
        + (3 * hid_p + cls_p) * 4                                     # biases (f32)
        + Bp * cls_p * 2)                                             # out (bf16)

    resident = lambda i: (0, 0)  # weights/biases stay put across batch tiles

    out = pl.pallas_call(
        mlp_kernel,
        out_shape=jax.ShapeDtypeStruct((Bp, cls_p), jnp.bfloat16),
        grid_spec=pltpu.PrefetchScalarGridSpec(
            num_scalar_prefetch=0,
            grid=grid,
            in_specs=[
                pl.BlockSpec((tb_eff, in_f), lambda i: (i, 0)),
                pl.BlockSpec((in_f, hid_p), resident),
                pl.BlockSpec((1, hid_p), resident),
                pl.BlockSpec((hid_p, hid_p), resident),
                pl.BlockSpec((1, hid_p), resident),
                pl.BlockSpec((hid_p, hid_p), resident),
                pl.BlockSpec((1, hid_p), resident),
                pl.BlockSpec((hid_p, cls_p), resident),
                pl.BlockSpec((1, cls_p), resident),
            ],
            out_specs=pl.BlockSpec((tb_eff, cls_p), lambda i: (i, 0)),
        ),
        compiler_params=pltpu.CompilerParams(
            dimension_semantics=("parallel",)),
        cost_estimate=pl.CostEstimate(
            flops=flops, transcendentals=0, bytes_accessed=bytes_accessed),
    )(xp, pparams["w1"], pparams["b1"], pparams["w2"], pparams["b2"],
      pparams["w3"], pparams["b3"], pparams["w4"], pparams["b4"])

    # Slice padded rows/columns off; return f32 logits (PyTorch semantics).
    return out[:B, :classes].astype(jnp.float32)


def init_params(key, input_size, hidden, classes):
    """Deterministic init mimicking nn.Linear default (uniform +-1/sqrt(fan_in)).
    Weights stored pre-transposed as (in, out)."""
    def linear(k, fan_in, fan_out):
        kw, kb = jax.random.split(k)
        bound = 1.0 / jnp.sqrt(jnp.float32(fan_in))
        w = jax.random.uniform(kw, (fan_in, fan_out), jnp.float32, -bound, bound)
        b = jax.random.uniform(kb, (1, fan_out), jnp.float32, -bound, bound)
        return w, b

    k1, k2, k3, k4 = jax.random.split(key, 4)
    w1, b1 = linear(k1, input_size, hidden)
    w2, b2 = linear(k2, hidden, hidden)
    w3, b3 = linear(k3, hidden, hidden)
    w4, b4 = linear(k4, hidden, classes)
    return dict(w1=w1, b1=b1, w2=w2, b2=b2, w3=w3, b3=b3, w4=w4, b4=b4)


def reference_forward(x, p):
    """Same precision recipe as the kernel: bf16 matmul operands, f32 accum,
    bf16 final store."""
    def dot(a, w):
        return jnp.dot(a.astype(jnp.bfloat16), w.astype(jnp.bfloat16),
                       preferred_element_type=jnp.float32)
    h = jnp.maximum(dot(x, p["w1"]) + p["b1"], 0.0)
    h = jnp.maximum(dot(h, p["w2"]) + p["b2"], 0.0)
    h = jnp.maximum(dot(h, p["w3"]) + p["b3"], 0.0)
    out = dot(h, p["w4"]) + p["b4"]
    return out.astype(jnp.bfloat16).astype(jnp.float32)


def reference_forward_f32(x, p):
    h = jnp.maximum(x @ p["w1"] + p["b1"], 0.0)
    h = jnp.maximum(h @ p["w2"] + p["b2"], 0.0)
    h = jnp.maximum(h @ p["w3"] + p["b3"], 0.0)
    return h @ p["w4"] + p["b4"]


if __name__ == "__main__":
    InputSize, HiddenLayersSize, classes = 32, 64, 10

    key = jax.random.PRNGKey(0)
    kx1, kx2, kp = jax.random.split(key, 3)

    params = init_params(kp, InputSize, HiddenLayersSize, classes)
    pparams = prepare_params(params)   # pad/cast once, reused every forward

    # batch=8: single-tile path; batch=300: multi-tile grid + row padding.
    for batch, kx in ((8, kx1), (300, kx2)):
        x = jax.random.normal(kx, (batch, InputSize), jnp.float32)

        out = jax.block_until_ready(neural_net_forward(x, pparams, classes=classes))
        assert out.shape == (batch, classes)

        ref = reference_forward(x, params)
        ref_f32 = reference_forward_f32(x, params)

        # Exact-path check (bf16 operands, f32 accumulation, bf16 store in both).
        assert jnp.allclose(out, ref, atol=1e-2, rtol=1e-2), \
            f"mismatch vs bf16 reference (batch={batch})"
        # Loose check vs pure-f32 math (bf16 rounding only).
        assert jnp.allclose(out, ref_f32, atol=7e-2, rtol=7e-2), \
            f"mismatch vs f32 reference (batch={batch})"

    print("KERNEL_OK")
</pallas_src>

<mosaic_0001>
module attributes {stable_mosaic.version = 11 : i64} {
  func.func @mlp_kernel(%arg0: i32, %arg1: memref<16x32xf32, #tpu.memory_space<vmem>>, %arg2: memref<32x128xbf16, #tpu.memory_space<vmem>>, %arg3: memref<1x128xf32, #tpu.memory_space<vmem>>, %arg4: memref<128x128xbf16, #tpu.memory_space<vmem>>, %arg5: memref<1x128xf32, #tpu.memory_space<vmem>>, %arg6: memref<128x128xbf16, #tpu.memory_space<vmem>>, %arg7: memref<1x128xf32, #tpu.memory_space<vmem>>, %arg8: memref<128x128xbf16, #tpu.memory_space<vmem>>, %arg9: memref<1x128xf32, #tpu.memory_space<vmem>>, %arg10: memref<16x128xbf16, #tpu.memory_space<vmem>>) attributes {dimension_semantics = [#tpu.dimension_semantics<parallel>], iteration_bounds = array<i64: 1>, scalar_prefetch = 0 : i64, scratch_operands = 0 : i64, tpu.core_type = #tpu.core_type<tc>, window_params = [{transform_indices = @transform_0, window_bounds = array<i64: 16, 32>}, {pipeline_mode = #tpu.pipeline_mode<synchronous>, transform_indices = @transform_1, window_bounds = array<i64: 32, 128>}, {pipeline_mode = #tpu.pipeline_mode<synchronous>, transform_indices = @transform_2, window_bounds = array<i64: 1, 128>}, {pipeline_mode = #tpu.pipeline_mode<synchronous>, transform_indices = @transform_3, window_bounds = array<i64: 128, 128>}, {pipeline_mode = #tpu.pipeline_mode<synchronous>, transform_indices = @transform_4, window_bounds = array<i64: 1, 128>}, {pipeline_mode = #tpu.pipeline_mode<synchronous>, transform_indices = @transform_5, window_bounds = array<i64: 128, 128>}, {pipeline_mode = #tpu.pipeline_mode<synchronous>, transform_indices = @transform_6, window_bounds = array<i64: 1, 128>}, {pipeline_mode = #tpu.pipeline_mode<synchronous>, transform_indices = @transform_7, window_bounds = array<i64: 128, 128>}, {pipeline_mode = #tpu.pipeline_mode<synchronous>, transform_indices = @transform_8, window_bounds = array<i64: 1, 128>}, {transform_indices = @transform_9, window_bounds = array<i64: 16, 128>}]} {
    %c0 = arith.constant 0 : index
    %c0_0 = arith.constant 0 : index
    %0 = vector.load %arg1[%c0, %c0_0] : memref<16x32xf32, #tpu.memory_space<vmem>>, vector<16x32xf32>
    %1 = arith.truncf %0 : vector<16x32xf32> to vector<16x32xbf16>
    %c0_1 = arith.constant 0 : index
    %c0_2 = arith.constant 0 : index
    %2 = vector.load %arg2[%c0_1, %c0_2] : memref<32x128xbf16, #tpu.memory_space<vmem>>, vector<32x128xbf16>
    %cst = arith.constant dense<0.000000e+00> : vector<16x128xf32>
    %3 = tpu.matmul %1, %2, %cst {dimension_numbers = #tpu.dot_dimension_numbers<[1], [0], [0], [1], [0, 0, 1, 1], [], []>} : vector<16x32xbf16>, vector<32x128xbf16>, vector<16x128xf32> -> vector<16x128xf32>
    %c0_3 = arith.constant 0 : index
    %c0_4 = arith.constant 0 : index
    %4 = vector.load %arg3[%c0_3, %c0_4] : memref<1x128xf32, #tpu.memory_space<vmem>>, vector<1x128xf32>
    %5 = vector.broadcast %4 : vector<1x128xf32> to vector<16x128xf32>
    %6 = arith.addf %3, %5 : vector<16x128xf32>
    %cst_5 = arith.constant 0.000000e+00 : f32
    %7 = vector.broadcast %cst_5 : f32 to vector<16x128xf32>
    %8 = arith.maximumf %6, %7 : vector<16x128xf32>
    %9 = arith.truncf %8 : vector<16x128xf32> to vector<16x128xbf16>
    %c0_6 = arith.constant 0 : index
    %c0_7 = arith.constant 0 : index
    %10 = vector.load %arg4[%c0_6, %c0_7] : memref<128x128xbf16, #tpu.memory_space<vmem>>, vector<128x128xbf16>
    %cst_8 = arith.constant dense<0.000000e+00> : vector<16x128xf32>
    %11 = tpu.matmul %9, %10, %cst_8 {dimension_numbers = #tpu.dot_dimension_numbers<[1], [0], [0], [1], [0, 0, 1, 1], [], []>} : vector<16x128xbf16>, vector<128x128xbf16>, vector<16x128xf32> -> vector<16x128xf32>
    %c0_9 = arith.constant 0 : index
    %c0_10 = arith.constant 0 : index
    %12 = vector.load %arg5[%c0_9, %c0_10] : memref<1x128xf32, #tpu.memory_space<vmem>>, vector<1x128xf32>
    %13 = vector.broadcast %12 : vector<1x128xf32> to vector<16x128xf32>
    %14 = arith.addf %11, %13 : vector<16x128xf32>
    %cst_11 = arith.constant 0.000000e+00 : f32
    %15 = vector.broadcast %cst_11 : f32 to vector<16x128xf32>
    %16 = arith.maximumf %14, %15 : vector<16x128xf32>
    %17 = arith.truncf %16 : vector<16x128xf32> to vector<16x128xbf16>
    %c0_12 = arith.constant 0 : index
    %c0_13 = arith.constant 0 : index
    %18 = vector.load %arg6[%c0_12, %c0_13] : memref<128x128xbf16, #tpu.memory_space<vmem>>, vector<128x128xbf16>
    %cst_14 = arith.constant dense<0.000000e+00> : vector<16x128xf32>
    %19 = tpu.matmul %17, %18, %cst_14 {dimension_numbers = #tpu.dot_dimension_numbers<[1], [0], [0], [1], [0, 0, 1, 1], [], []>} : vector<16x128xbf16>, vector<128x128xbf16>, vector<16x128xf32> -> vector<16x128xf32>
    %c0_15 = arith.constant 0 : index
    %c0_16 = arith.constant 0 : index
    %20 = vector.load %arg7[%c0_15, %c0_16] : memref<1x128xf32, #tpu.memory_space<vmem>>, vector<1x128xf32>
    %21 = vector.broadcast %20 : vector<1x128xf32> to vector<16x128xf32>
    %22 = arith.addf %19, %21 : vector<16x128xf32>
    %cst_17 = arith.constant 0.000000e+00 : f32
    %23 = vector.broadcast %cst_17 : f32 to vector<16x128xf32>
    %24 = arith.maximumf %22, %23 : vector<16x128xf32>
    %25 = arith.truncf %24 : vector<16x128xf32> to vector<16x128xbf16>
    %c0_18 = arith.constant 0 : index
    %c0_19 = arith.constant 0 : index
    %26 = vector.load %arg8[%c0_18, %c0_19] : memref<128x128xbf16, #tpu.memory_space<vmem>>, vector<128x128xbf16>
    %cst_20 = arith.constant dense<0.000000e+00> : vector<16x128xf32>
    %27 = tpu.matmul %25, %26, %cst_20 {dimension_numbers = #tpu.dot_dimension_numbers<[1], [0], [0], [1], [0, 0, 1, 1], [], []>} : vector<16x128xbf16>, vector<128x128xbf16>, vector<16x128xf32> -> vector<16x128xf32>
    %c0_21 = arith.constant 0 : index
    %c0_22 = arith.constant 0 : index
    %28 = vector.load %arg9[%c0_21, %c0_22] : memref<1x128xf32, #tpu.memory_space<vmem>>, vector<1x128xf32>
    %29 = vector.broadcast %28 : vector<1x128xf32> to vector<16x128xf32>
    %30 = arith.addf %27, %29 : vector<16x128xf32>
    %31 = arith.truncf %30 : vector<16x128xf32> to vector<16x128xbf16>
    %c0_23 = arith.constant 0 : index
    %c0_24 = arith.constant 0 : index
    %32 = vector.load %arg10[%c0_23, %c0_24] : memref<16x128xbf16, #tpu.memory_space<vmem>>, vector<16x128xbf16>
    tpu.vector_store %arg10[%c0_23, %c0_24], %31 {strides = array<i32>} : memref<16x128xbf16, #tpu.memory_space<vmem>>, vector<16x128xbf16>,
    return
  }
  func.func @transform_0(%arg0: i32) -> (i32, i32) {
    %c0_i32 = arith.constant 0 : i32
    %c0_i32_0 = arith.constant 0 : i32
    return %arg0, %c0_i32 : i32, i32
  }
  func.func @transform_1(%arg0: i32) -> (i32, i32) {
    %c0_i32 = arith.constant 0 : i32
    %c0_i32_0 = arith.constant 0 : i32
    %c0_i32_1 = arith.constant 0 : i32
    return %c0_i32, %c0_i32_0 : i32, i32
  }
  func.func @transform_2(%arg0: i32) -> (i32, i32) {
    %c0_i32 = arith.constant 0 : i32
    %c0_i32_0 = arith.constant 0 : i32
    %c0_i32_1 = arith.constant 0 : i32
    return %c0_i32, %c0_i32_0 : i32, i32
  }
  func.func @transform_3(%arg0: i32) -> (i32, i32) {
    %c0_i32 = arith.constant 0 : i32
    %c0_i32_0 = arith.constant 0 : i32
    %c0_i32_1 = arith.constant 0 : i32
    return %c0_i32, %c0_i32_0 : i32, i32
  }
  func.func @transform_4(%arg0: i32) -> (i32, i32) {
    %c0_i32 = arith.constant 0 : i32
    %c0_i32_0 = arith.constant 0 : i32
    %c0_i32_1 = arith.constant 0 : i32
    return %c0_i32, %c0_i32_0 : i32, i32
  }
  func.func @transform_5(%arg0: i32) -> (i32, i32) {
    %c0_i32 = arith.constant 0 : i32
    %c0_i32_0 = arith.constant 0 : i32
    %c0_i32_1 = arith.constant 0 : i32
    return %c0_i32, %c0_i32_0 : i32, i32
  }
  func.func @transform_6(%arg0: i32) -> (i32, i32) {
    %c0_i32 = arith.constant 0 : i32
    %c0_i32_0 = arith.constant 0 : i32
    %c0_i32_1 = arith.constant 0 : i32
    return %c0_i32, %c0_i32_0 : i32, i32
  }
  func.func @transform_7(%arg0: i32) -> (i32, i32) {
    %c0_i32 = arith.constant 0 : i32
    %c0_i32_0 = arith.constant 0 : i32
    %c0_i32_1 = arith.constant 0 : i32
    return %c0_i32, %c0_i32_0 : i32, i32
  }
  func.func @transform_8(%arg0: i32) -> (i32, i32) {
    %c0_i32 = arith.constant 0 : i32
    %c0_i32_0 = arith.constant 0 : i32
    %c0_i32_1 = arith.constant 0 : i32
    return %c0_i32, %c0_i32_0 : i32, i32
  }
  func.func @transform_9(%arg0: i32) -> (i32, i32) {
    %c0_i32 = arith.constant 0 : i32
    %c0_i32_0 = arith.constant 0 : i32
    return %arg0, %c0_i32 : i32, i32
  }
}

</mosaic_0001>

<bundles_post_ra>
// kernel: neural_net_forward.1
= control target key start
LH: loop header
LB: loop body
LE: loop exit
PB: predicated region body
PF: predicated region fallthrough
CT: control target
= control target key end

     0   :  { %14 = vsyncpa [#allocation3], 0  ;;  %s917_s0 = inlined_call_operand.vmem [shape: f32[16,32], index: 0, kind: input, shape index: {}]   ;;  %s918_s1 = inlined_call_operand.vmem [shape: bf16[32,128], index: 1, kind: input, shape index: {}]   ;;  %s919_s2 = inlined_call_operand.vmem [shape: f32[1,128], index: 2, kind: input, shape index: {}]   ;;  %s920_s3 = inlined_call_operand.hbm [shape: bf16[128,128], index: 3, kind: input, shape index: {}]   ;;  %s921_s4 = inlined_call_operand.vmem [shape: f32[1,128], index: 4, kind: input, shape index: {}]   ;;  %s922_s5 = inlined_call_operand.hbm [shape: bf16[128,128], index: 5, kind: input, shape index: {}]   ;;  %s923_s6 = inlined_call_operand.vmem [shape: f32[1,128], index: 6, kind: input, shape index: {}]   ;;  %s924_s7 = inlined_call_operand.hbm [shape: bf16[128,128], index: 7, kind: input, shape index: {}]   ;;  %s925_s8 = inlined_call_operand.vmem [shape: f32[1,128], index: 8, kind: input, shape index: {}]   ;;  %s926_s9 = inlined_call_operand.vmem [shape: bf16[16,128], index: 9, kind: output, shape index: {}]  }
   0x1   :  { %15 = vsyncpa [#allocation5], 0  ;;  %s747_s30 = smov [#allocation4]   ;;  %s748_s11 = smov [#allocation2]  }
   0x2   :  { %s41_s10 = sshll.u32 %s747_s30, 4  ;;  %s27_s12 = sshll.u32 %s748_s11, 4  ;;  %s42_s10 = int_to_ptr.vmem [resolvable:$true] %s41_s10  ;;  %s804_s12 = int_to_ptr.vmem [resolvable:$true] %s27_s12 }
   0x3   :  { %s677_s15 = scalar_lea.hbm %s922_s5, 1024 }
   0x4   :  { %p678_p0 = scmp.ne.s32.totalorder %s922_s5, %s677_s15  ;;  %p681_p1 = scmp.lt.u32.totalorder %s677_s15, %s922_s5 }
   0x6   :  { %p683_p2 = pnand %p681_p1, %p678_p0 }
   0x8   :  { %686 = shalt.err (!%p683_p2)
}
   0x9   :  { %s687_s20 = scalar_lea.vmem %s42_s10, 1024  ;;  %p692_p4 = scmp.lt.s32.totalorder %s42_s10, %s42_s10 }
   0xa   :  { %p688_p3 = scmp.ne.s32.totalorder %s42_s10, %s687_s20  ;;  %p693_p5 = scmp.lt.s32.totalorder %s687_s20, %s687_s20 }
   0xc   :  { %p694_p6 = por %p693_p5, %p692_p4 }
   0xe   :  { %p695_p7 = pnand %p694_p6, %p688_p3 }
  0x10   :  { %698 = shalt.err (!%p695_p7)
}
  0x11   :  { %s749_s21 = smov 64   ;;  %s750_s22 = smov 4  }
  0x12   :  { %47 = dma.hbm_to_vmem [thread:$0]  %s922_s5, 1024, %s42_s10, [#allocation5], %s749_s21, %s749_s21, %s750_s22  }
  0x13   :  { %s699_s27 = scalar_lea.hbm %s920_s3, 1024 }
  0x14   :  { %p700_p8 = scmp.ne.s32.totalorder %s920_s3, %s699_s27  ;;  %p703_p9 = scmp.lt.u32.totalorder %s699_s27, %s920_s3 }
  0x16   :  { %p705_p10 = pnand %p703_p9, %p700_p8 }
  0x18   :  { %708 = shalt.err (!%p705_p10)
}
  0x19   :  { %s709_s13 = scalar_lea.vmem %s804_s12, 1024  ;;  %p714_p12 = scmp.lt.s32.totalorder %s804_s12, %s804_s12 }
  0x1a   :  { %p710_p11 = scmp.ne.s32.totalorder %s804_s12, %s709_s13  ;;  %p715_p13 = scmp.lt.s32.totalorder %s709_s13, %s709_s13 }
  0x1c   :  { %p716_p0 = por %p715_p13, %p714_p12 }
  0x1e   :  { %p717_p1 = pnand %p716_p0, %p710_p11 }
  0x20   :  { %720 = shalt.err (!%p717_p1)
}
  0x21   :  { %33 = dma.hbm_to_vmem [thread:$0]  %s920_s3, 1024, %s804_s12, [#allocation3], %s749_s21, %s749_s21, %s750_s22  }
  0x22   :  { %s751_s14 = smov [#allocation6]   ;;  %s721_s18 = scalar_lea.hbm %s924_s7, 1024 }
  0x23   :  { %s55_s15 = sshll.u32 %s751_s14, 4  ;;  %p722_p2 = scmp.ne.s32.totalorder %s924_s7, %s721_s18  ;;  %s56_s15 = int_to_ptr.vmem [resolvable:$true] %s55_s15 }
  0x24   :  { %p725_p3 = scmp.lt.u32.totalorder %s721_s18, %s924_s7 }
  0x26   :  { %p727_p4 = pnand %p725_p3, %p722_p2 }
  0x28   :  { %730 = shalt.err (!%p727_p4)
}
  0x29   :  { %s731_s25 = scalar_lea.vmem %s56_s15, 1024  ;;  %p736_p6 = scmp.lt.s32.totalorder %s56_s15, %s56_s15 }
  0x2a   :  { %p732_p5 = scmp.ne.s32.totalorder %s56_s15, %s731_s25  ;;  %p737_p7 = scmp.lt.s32.totalorder %s731_s25, %s731_s25 }
  0x2c   :  { %p738_p8 = por %p737_p7, %p736_p6 }
  0x2e   :  { %p739_p9 = pnand %p738_p8, %p732_p5 }
  0x30   :  { %742 = shalt.err (!%p739_p9)
}
  0x31   :  { %61 = dma.hbm_to_vmem [thread:$0]  %s924_s7, 1024, %s56_s15, [#allocation5], %s749_s21, %s749_s21, %s750_s22  }
  0x32   :  { %743 = dma.done.wait [#allocation3], 1024  }
  0x33   :  { %744 = vsyncadd [#allocation3], 4294966272 }
  0x34   :  { %745 = dma.done.wait [#allocation5], 2048  }
  0x35   :  { %746 = vsyncadd [#allocation5], 4294965248  ;;  %v752_v0 = vmov 0.0   ;;  %vm753_vm0 = vmmov 0   ;;  %v651_v1 = vld [vmem:[%s918_s1] sm:$0xff]   ;;  %v652_v2 = vld [vmem:[%s918_s1 + $0x8] sm:$0xff]  }
  0x36   :  { %576 = vmatprep.subr.bf16.mxu0 %v752_v0  ;;  %580 = vmatprep.mubr.msk.bf16.mxu0 %vm753_vm0, %v752_v0  ;;  %v74_v3 = vld [vmem:[%s917_s0] sm:$0xff]  ;;  %v75_v4 = vld [vmem:[%s917_s0 + $0x8] sm:$0xff]  ;;  %v653_v5 = vld [vmem:[#allocation2] sm:$0xff]   ;;  %vm100_vm1 = vcmask 261120  }
  0x37   :  { %584 = vmatprep.subr.bf16.mxu1 %v752_v0  ;;  %600 = vmatprep.mubr.msk.bf16.mxu1 %vm753_vm0, %v752_v0  ;;  %v76_v6 = vpack.c.bf16 %v75_v4, %v74_v3  ;;  %v654_v7 = vld [vmem:[#allocation2 + $0x8] sm:$0xff]   ;;  %v655_v8 = vld [vmem:[#allocation2 + $0x10] sm:$0xff]   ;;  %v656_v9 = vld [vmem:[#allocation2 + $0x18] sm:$0xff]  }
  0x38   :  { %577 = vmatpush3.bf16.msra.mxu0 %v651_v1  ;;  %585 = vmatpush3.bf16.msra.mxu1 %v653_v5  ;;  %v657_v10 = vld [vmem:[#allocation2 + $0x20] sm:$0xff]   ;;  %v658_v11 = vld [vmem:[#allocation2 + $0x28] sm:$0xff]   ;;  %v659_v12 = vld [vmem:[#allocation2 + $0x30] sm:$0xff]  }
  0x39   :  { %578 = vmatprep.subr.bf16.mxu0 %v752_v0  ;;  %586 = vmatprep.subr.bf16.mxu1 %v752_v0  ;;  %v660_v13 = vld [vmem:[#allocation2 + $0x38] sm:$0xff]   ;;  %v661_v14 = vld [vmem:[#allocation4] sm:$0xff]   ;;  %v662_v15 = vld [vmem:[#allocation4 + $0x8] sm:$0xff]  }
  0x3a   :  { %v663_v16 = vld [vmem:[#allocation4 + $0x10] sm:$0xff]   ;;  %v664_v17 = vld [vmem:[#allocation4 + $0x18] sm:$0xff]   ;;  %v665_v18 = vld [vmem:[#allocation4 + $0x20] sm:$0xff]  }
  0x3b   :  { %v666_v19 = vld [vmem:[#allocation4 + $0x28] sm:$0xff]   ;;  %v506_v20 = vld [vmem:[%s919_s2] ss:$0 sm:$0xff]  ;;  %v668_v31 = vld [vmem:[#allocation4 + $0x38] sm:$0xff]  }
  0x3c   :  { %579 = vmatpush3.bf16.msra.mxu0 %v652_v2  ;;  %587 = vmatpush3.bf16.msra.mxu1 %v654_v7  ;;  %v667_v30 = vld [vmem:[#allocation4 + $0x30] sm:$0xff]   ;;  %v669_v32 = vld [vmem:[#allocation6] sm:$0xff]   ;;  %v670_v33 = vld [vmem:[#allocation6 + $0x8] sm:$0xff]  }
  0x3d   :  { %604 = vmatprep.subr.bf16.mxu0 %v752_v0  ;;  %588 = vmatprep.subr.bf16.mxu1 %v752_v0  ;;  %v671_v34 = vld [vmem:[#allocation6 + $0x10] sm:$0xff]   ;;  %v672_v35 = vld [vmem:[#allocation6 + $0x18] sm:$0xff]   ;;  %v673_v36 = vld [vmem:[#allocation6 + $0x20] sm:$0xff]  }
  0x3e   :  { %v674_v37 = vld [vmem:[#allocation6 + $0x28] sm:$0xff]   ;;  %v510_v38 = vld [vmem:[%s921_s4] ss:$0 sm:$0xff]  ;;  %v676_v49 = vld [vmem:[#allocation6 + $0x38] sm:$0xff]  }
  0x3f   :  { %581 = vmatmul.mubr.msk.bf16.vlgmr.msra.gmra.mrb[0].mxu0 %vm100_vm1, %v76_v6  ;;  %v675_v48 = vld [vmem:[#allocation6 + $0x30] sm:$0xff]  }
  0x40   :  { %620 = vmatprep.mubr.msk.bf16.mxu0 %vm753_vm0, %v752_v0  ;;  %589 = vmatpush3.bf16.msra.mxu1 %v655_v8  ;;  %v519_v50 = vld [vmem:[%s923_s6] ss:$0 sm:$0xff] }
  0x41   :  { %590 = vmatprep.subr.bf16.mxu1 %v752_v0  ;;  %605 = vmatpush3.bf16.msra.mxu0 %v661_v14  ;;  %v528_v60 = vld [vmem:[%s925_s8] ss:$0 sm:$0xff] }
  0x42   :  { %606 = vmatprep.subr.bf16.mxu0 %v752_v0 }
  0x44   :  { %591 = vmatpush3.bf16.msra.mxu1 %v656_v9 }
  0x45   :  { %592 = vmatprep.subr.bf16.mxu1 %v752_v0  ;;  %607 = vmatpush3.bf16.msra.mxu0 %v662_v15 }
  0x46   :  { %608 = vmatprep.subr.bf16.mxu0 %v752_v0 }
  0x48   :  { %593 = vmatpush3.bf16.msra.mxu1 %v657_v10 }
  0x49   :  { %594 = vmatprep.subr.bf16.mxu1 %v752_v0  ;;  %609 = vmatpush3.bf16.msra.mxu0 %v663_v16 }
  0x4a   :  { %610 = vmatprep.subr.bf16.mxu0 %v752_v0 }
  0x4c   :  { %595 = vmatpush3.bf16.msra.mxu1 %v658_v11 }
  0x4d   :  { %596 = vmatprep.subr.bf16.mxu1 %v752_v0  ;;  %611 = vmatpush3.bf16.msra.mxu0 %v664_v17 }
  0x4e   :  { %612 = vmatprep.subr.bf16.mxu0 %v752_v0 }
  0x50   :  { %597 = vmatpush3.bf16.msra.mxu1 %v659_v12 }
  0x51   :  { %598 = vmatprep.subr.bf16.mxu1 %v752_v0  ;;  %613 = vmatpush3.bf16.msra.mxu0 %v665_v18 }
  0x52   :  { %614 = vmatprep.subr.bf16.mxu0 %v752_v0 }
  0x54   :  { %599 = vmatpush3.bf16.msra.mxu1 %v660_v13 }
  0x55   :  { %624 = vmatprep.subr.bf16.mxu1 %v752_v0  ;;  %615 = vmatpush3.bf16.msra.mxu0 %v666_v19 }
  0x56   :  { %616 = vmatprep.subr.bf16.mxu0 %v752_v0 }
  0x59   :  { %617 = vmatpush3.bf16.msra.mxu0 %v667_v30 }
  0x5a   :  { %618 = vmatprep.subr.bf16.mxu0 %v752_v0 }
  0x5d   :  { %619 = vmatpush3.bf16.msra.mxu0 %v668_v31 }
 0x112   :  { %v138_v21 = vpop.f32.mrb[0].mxu0 }
 0x113   :  { %v139_v22 = vadd.f32 %v506_v20, %v138_v21  ;;  %v582_v23 = vpop.f32.mrb[1].mxu0 }
 0x114   :  { %v141_v24 = vpop.f32.mrb[2].mxu0 }
 0x115   :  { %v142_v25 = vadd.f32 %v506_v20, %v141_v24  ;;  %v583_v26 = vpop.f32.mrb[3].mxu0  ;;  %v145_v27 = vmax.f32 %v139_v22, 0.0 }
 0x117   :  { %v146_v28 = vmax.f32 %v142_v25, 0.0 }
 0x119   :  { %v147_v29 = vpack.c.bf16 %v146_v28, %v145_v27 }
 0x11b   :  { %601 = vmatmul.mubr.bf16.vlgmr.msra.gmra.mrb[0].mxu1 %v147_v29 }
 0x11c   :  { %640 = vmatprep.mubr.msk.bf16.mxu1 %vm753_vm0, %v752_v0  ;;  %625 = vmatpush3.bf16.msra.mxu1 %v669_v32 }
 0x11d   :  { %626 = vmatprep.subr.bf16.mxu1 %v752_v0 }
 0x120   :  { %627 = vmatpush3.bf16.msra.mxu1 %v670_v33 }
 0x121   :  { %628 = vmatprep.subr.bf16.mxu1 %v752_v0 }
 0x124   :  { %629 = vmatpush3.bf16.msra.mxu1 %v671_v34 }
 0x125   :  { %630 = vmatprep.subr.bf16.mxu1 %v752_v0 }
 0x128   :  { %631 = vmatpush3.bf16.msra.mxu1 %v672_v35 }
 0x129   :  { %632 = vmatprep.subr.bf16.mxu1 %v752_v0 }
 0x12c   :  { %633 = vmatpush3.bf16.msra.mxu1 %v673_v36 }
 0x12d   :  { %634 = vmatprep.subr.bf16.mxu1 %v752_v0 }
 0x130   :  { %635 = vmatpush3.bf16.msra.mxu1 %v674_v37 }
 0x131   :  { %636 = vmatprep.subr.bf16.mxu1 %v752_v0 }
 0x134   :  { %637 = vmatpush3.bf16.msra.mxu1 %v675_v48 }
 0x135   :  { %638 = vmatprep.subr.bf16.mxu1 %v752_v0 }
 0x138   :  { %639 = vmatpush3.bf16.msra.mxu1 %v676_v49 }
 0x1ee   :  { %v253_v39 = vpop.f32.mrb[0].mxu1 }
 0x1ef   :  { %v254_v40 = vadd.f32 %v510_v38, %v253_v39  ;;  %v602_v41 = vpop.f32.mrb[1].mxu1 }
 0x1f0   :  { %v256_v42 = vpop.f32.mrb[2].mxu1 }
 0x1f1   :  { %v257_v43 = vadd.f32 %v510_v38, %v256_v42  ;;  %v603_v44 = vpop.f32.mrb[3].mxu1  ;;  %v260_v45 = vmax.f32 %v254_v40, 0.0 }
 0x1f3   :  { %v261_v46 = vmax.f32 %v257_v43, 0.0 }
 0x1f5   :  { %v262_v47 = vpack.c.bf16 %v261_v46, %v260_v45 }
 0x1f7   :  { %621 = vmatmul.mubr.bf16.vlgmr.msra.gmra.mrb[4].mxu0 %v262_v47 }
 0x2ca   :  { %v368_v51 = vpop.f32.mrb[4].mxu0 }
 0x2cb   :  { %v369_v52 = vadd.f32 %v519_v50, %v368_v51  ;;  %v622_v53 = vpop.f32.mrb[5].mxu0 }
 0x2cc   :  { %v371_v54 = vpop.f32.mrb[6].mxu0 }
 0x2cd   :  { %v372_v55 = vadd.f32 %v519_v50, %v371_v54  ;;  %v623_v56 = vpop.f32.mrb[7].mxu0  ;;  %v375_v57 = vmax.f32 %v369_v52, 0.0 }
 0x2cf   :  { %v376_v58 = vmax.f32 %v372_v55, 0.0 }
 0x2d1   :  { %v377_v59 = vpack.c.bf16 %v376_v58, %v375_v57 }
 0x2d3   :  { %641 = vmatmul.mubr.bf16.vlgmr.msra.gmra.mrb[4].mxu1 %v377_v59 }
 0x3a6   :  { %v483_v61 = vpop.f32.mrb[4].mxu1 }
 0x3a7   :  { %v642_v62 = vpop.f32.mrb[5].mxu1  ;;  %v484_v0 = vadd.f32 %v528_v60, %v483_v61 }
 0x3a8   :  { %v486_v63 = vpop.f32.mrb[6].mxu1 }
 0x3a9   :  { %v487_v1 = vadd.f32 %v528_v60, %v486_v63  ;;  %v643_v2 = vpop.f32.mrb[7].mxu1 }
 0x3ab   :  { %v544_v3 = vpack.c.bf16 %v487_v1, %v484_v0 }
 0x3ad   :  { %545 = vst [vmem:[%s926_s9] sm:$0xff] %v544_v3  }
 0x3ae   :  { %504 = vsyncpa [#allocation3], 1 }
 0x3af   :  { %505 = vsyncpa [#allocation5], 1 }

</bundles_post_ra>
